<compile_context>
chip_gen: v7x
topology: tpu7x:2x2x1
jax: 0.10.0
libtpu: 0.0.40
codegen_flags: <defaults>
</compile_context>

<pallas_src>
import functools
import math

import jax
import jax.numpy as jnp
from jax.experimental import pallas as pl
from jax.experimental.pallas import tpu as pltpu

_SUBLANE = 8  # second-to-last dim alignment for batch tiles


def _round_up(n, m):
    return ((n + m - 1) // m) * m


def _fused_mlp_kernel(*refs, num_layers, residual_flags):
    """Fused forward: x -> [Linear -> GELU(tanh approx) (+residual)] * num_layers.

    refs = (x_ref, w0_ref, b0_ref, ..., w{L-1}_ref, b{L-1}_ref, o_ref).
    Weights may be bf16 (MXU-native); bias/GELU/residual math is f32.
    """
    x_ref = refs[0]
    o_ref = refs[-1]
    c = jnp.float32(math.sqrt(2.0 / math.pi))

    x = x_ref[...].astype(jnp.float32)
    for i in range(num_layers):
        w_ref = refs[1 + 2 * i]
        b_ref = refs[2 + 2 * i]
        # MXU matmul (bf16 or f32 operands), f32 accumulation.
        xm = x.astype(w_ref.dtype)
        y = jnp.dot(xm, w_ref[...], preferred_element_type=jnp.float32)
        y = y + b_ref[...].astype(jnp.float32)
        # GELU, tanh approximation (exactly the PyTorch GELU module):
        # 0.5 * y * (1 + tanh(sqrt(2/pi) * (y + 0.044715 * y**3)))
        g = 0.5 * y * (1.0 + jnp.tanh(c * (y + 0.044715 * (jnp.square(y) * y))))
        if residual_flags[i]:
            x = g + x       # shapes match (din == dout for this layer)
        else:
            x = g
    o_ref[...] = x.astype(o_ref.dtype)


def _choose_tile_b(batch, din0, dout_last, max_dim, param_bytes):
    """Batch tile: big (amortize per-step overhead), VMEM-safe, >=2 steps when possible."""
    if batch <= _SUBLANE:
        return batch  # single full-extent block (legal even if batch < 8)
    budget = 12 * 1024 * 1024                      # headroom under v5e's 16 MiB scoped VMEM
    avail = max(budget - 2 * param_bytes, 1 << 20)
    # double-buffered in/out activation blocks + in-kernel f32 intermediates
    row_bytes = 4 * (2 * din0 + 2 * dout_last + 3 * max_dim)
    cap = max(_SUBLANE, (avail // row_bytes) // _SUBLANE * _SUBLANE)
    # aim for >=2 grid steps so the "parallel" axis shards across v7x's 2 TCs
    two_core = _round_up(pl.cdiv(batch, 2), _SUBLANE)
    return max(_SUBLANE, min(1024, cap, two_core))


def example_deep_neural_network(x, params, use_shortcut, *, matmul_dtype=None):
    """Forward pass matching ExampleDeepNeuralNetwork.forward.

    x: [batch, d0] f32.  params: list of (w_t [din, dout], b [dout]).
    matmul_dtype: None -> f32 matmuls; jnp.bfloat16 -> bf16 MXU path.
    """
    batch, din0 = x.shape
    num_layers = len(params)
    dout_last = params[-1][0].shape[1]

    # Residual applies when the full output shape equals the input shape;
    # batch never changes, so that reduces to din == dout (static per layer).
    residual_flags = tuple(
        bool(use_shortcut) and (w_t.shape[0] == w_t.shape[1]) for w_t, _ in params
    )

    wbytes = 2 if matmul_dtype == jnp.bfloat16 else 4
    param_bytes = sum(w.size * wbytes + b.size * 4 for w, b in params)
    dims = [din0] + [w.shape[1] for w, _ in params]
    tile_b = _choose_tile_b(batch, din0, dout_last, max(dims), param_bytes)
    grid = (pl.cdiv(batch, tile_b),)

    # Unpadded params; weights optionally cast to bf16 for MXU + half DMA bytes.
    flat_params = []
    wspecs = []
    io_bytes = x.size * x.dtype.itemsize + batch * dout_last * x.dtype.itemsize
    for w_t, b in params:
        din, dout = w_t.shape
        w = w_t.astype(matmul_dtype) if matmul_dtype is not None else w_t
        b2 = b.reshape(1, dout)
        flat_params.extend([w, b2])
        wspecs.append((din, dout))
        io_bytes += w.size * w.dtype.itemsize + b2.size * b2.dtype.itemsize

    # --- BlockSpecs: activation tiled over batch, weights constant-resident ---
    _const = lambda i: (0, 0)
    in_specs = [pl.BlockSpec((tile_b, din0), lambda i: (i, 0))]
    for din, dout in wspecs:
        in_specs.append(pl.BlockSpec((din, dout), _const))   # full-extent weight
        in_specs.append(pl.BlockSpec((1, dout), _const))      # full-extent bias
    out_spec = pl.BlockSpec((tile_b, dout_last), lambda i: (i, 0))

    kernel = functools.partial(_fused_mlp_kernel,
                               num_layers=num_layers,
                               residual_flags=residual_flags)

    cost = pl.CostEstimate(
        flops=2 * batch * sum(din * dout for din, dout in wspecs),
        transcendentals=batch * sum(dout for _, dout in wspecs),
        bytes_accessed=io_bytes,
    )

    return pl.pallas_call(
        kernel,
        out_shape=jax.ShapeDtypeStruct((batch, dout_last), x.dtype),
        grid=grid,
        in_specs=in_specs,
        out_specs=out_spec,
        compiler_params=pltpu.CompilerParams(
            dimension_semantics=("parallel",)),
        cost_estimate=cost,
    )(x, *flat_params)


def init_params(key, layer_sizes):
    """Deterministic nn.Linear-style init (Kaiming-uniform weights, uniform bias)."""
    params = []
    for i in range(len(layer_sizes) - 1):
        din, dout = layer_sizes[i], layer_sizes[i + 1]
        key, kw, kb = jax.random.split(key, 3)
        bound = 1.0 / math.sqrt(float(din))
        # PyTorch stores weight as [out, in]; we keep the transposed [in, out].
        w_t = jax.random.uniform(kw, (din, dout), jnp.float32, -bound, bound)
        b = jax.random.uniform(kb, (dout,), jnp.float32, -bound, bound)
        params.append((w_t, b))
    return params


def _reference(x, params, use_shortcut):
    """Pure-JAX reference for the correctness check."""
    c = math.sqrt(2.0 / math.pi)
    for w_t, b in params:
        y = x @ w_t + b
        g = 0.5 * y * (1.0 + jnp.tanh(c * (y + 0.044715 * y**3)))
        if use_shortcut and x.shape == g.shape:
            x = g + x
        else:
            x = g
    return x


if __name__ == "__main__":
    key = jax.random.PRNGKey(0)
    # 5 layers; last layer changes width so both the shortcut and
    # non-shortcut branches are exercised.
    layer_sizes = [32, 32, 32, 32, 32, 16]
    batch = 2

    key, kx = jax.random.split(key)
    x = jax.random.uniform(kx, (batch, layer_sizes[0]), jnp.float32)
    params = init_params(key, layer_sizes)

    # f32 MXU path: tight tolerance vs pure-JAX reference.
    for use_shortcut in (True, False):
        out = jax.block_until_ready(
            example_deep_neural_network(x, params, use_shortcut))
        ref = _reference(x, params, use_shortcut)
        assert out.shape == (batch, layer_sizes[-1])
        assert jnp.allclose(out, ref, atol=1e-5, rtol=1e-5), (
            f"f32 mismatch (use_shortcut={use_shortcut})")

    # bf16 MXU path (MXU-native, halves weight DMA); f32 accumulation -> loose tol.
    out_bf16 = jax.block_until_ready(
        example_deep_neural_network(x, params, True, matmul_dtype=jnp.bfloat16))
    ref = _reference(x, params, True)
    assert jnp.allclose(out_bf16, ref, atol=5e-2, rtol=5e-2), "bf16 mismatch"

    # Multi-step grid with a ragged batch (exercises cdiv edge-block masking
    # and the >=2-step split for v7x's two TensorCores).
    batch2 = 20
    key, kx2 = jax.random.split(key)
    x2 = jax.random.uniform(kx2, (batch2, layer_sizes[0]), jnp.float32)
    out2 = jax.block_until_ready(example_deep_neural_network(x2, params, True))
    ref2 = _reference(x2, params, True)
    assert out2.shape == (batch2, layer_sizes[-1])
    assert jnp.allclose(out2, ref2, atol=1e-5, rtol=1e-5), "ragged-batch mismatch"

    print("KERNEL_OK")
</pallas_src>

<mosaic_0001>
module attributes {stable_mosaic.version = 11 : i64} {
  func.func @_fused_mlp_kernel(%arg0: i32, %arg1: memref<2x32xf32, #tpu.memory_space<vmem>>, %arg2: memref<32x32xf32, #tpu.memory_space<vmem>>, %arg3: memref<1x32xf32, #tpu.memory_space<vmem>>, %arg4: memref<32x32xf32, #tpu.memory_space<vmem>>, %arg5: memref<1x32xf32, #tpu.memory_space<vmem>>, %arg6: memref<32x32xf32, #tpu.memory_space<vmem>>, %arg7: memref<1x32xf32, #tpu.memory_space<vmem>>, %arg8: memref<32x32xf32, #tpu.memory_space<vmem>>, %arg9: memref<1x32xf32, #tpu.memory_space<vmem>>, %arg10: memref<32x16xf32, #tpu.memory_space<vmem>>, %arg11: memref<1x16xf32, #tpu.memory_space<vmem>>, %arg12: memref<2x16xf32, #tpu.memory_space<vmem>>) attributes {dimension_semantics = [#tpu.dimension_semantics<parallel>], iteration_bounds = array<i64: 1>, scalar_prefetch = 0 : i64, scratch_operands = 0 : i64, tpu.core_type = #tpu.core_type<tc>, window_params = [{transform_indices = @transform_0, window_bounds = array<i64: 2, 32>}, {pipeline_mode = #tpu.pipeline_mode<synchronous>, transform_indices = @transform_1, window_bounds = array<i64: 32, 32>}, {pipeline_mode = #tpu.pipeline_mode<synchronous>, transform_indices = @transform_2, window_bounds = array<i64: 1, 32>}, {pipeline_mode = #tpu.pipeline_mode<synchronous>, transform_indices = @transform_3, window_bounds = array<i64: 32, 32>}, {pipeline_mode = #tpu.pipeline_mode<synchronous>, transform_indices = @transform_4, window_bounds = array<i64: 1, 32>}, {pipeline_mode = #tpu.pipeline_mode<synchronous>, transform_indices = @transform_5, window_bounds = array<i64: 32, 32>}, {pipeline_mode = #tpu.pipeline_mode<synchronous>, transform_indices = @transform_6, window_bounds = array<i64: 1, 32>}, {pipeline_mode = #tpu.pipeline_mode<synchronous>, transform_indices = @transform_7, window_bounds = array<i64: 32, 32>}, {pipeline_mode = #tpu.pipeline_mode<synchronous>, transform_indices = @transform_8, window_bounds = array<i64: 1, 32>}, {pipeline_mode = #tpu.pipeline_mode<synchronous>, transform_indices = @transform_9, window_bounds = array<i64: 32, 16>}, {pipeline_mode = #tpu.pipeline_mode<synchronous>, transform_indices = @transform_10, window_bounds = array<i64: 1, 16>}, {transform_indices = @transform_11, window_bounds = array<i64: 2, 16>}]} {
    %c0 = arith.constant 0 : index
    %c0_0 = arith.constant 0 : index
    %0 = vector.load %arg1[%c0, %c0_0] : memref<2x32xf32, #tpu.memory_space<vmem>>, vector<2x32xf32>
    %c0_1 = arith.constant 0 : index
    %c0_2 = arith.constant 0 : index
    %1 = vector.load %arg2[%c0_1, %c0_2] : memref<32x32xf32, #tpu.memory_space<vmem>>, vector<32x32xf32>
    %cst = arith.constant dense<0.000000e+00> : vector<2x32xf32>
    %2 = tpu.matmul %0, %1, %cst {dimension_numbers = #tpu.dot_dimension_numbers<[1], [0], [0], [1], [0, 0, 1, 1], [], []>} : vector<2x32xf32>, vector<32x32xf32>, vector<2x32xf32> -> vector<2x32xf32>
    %c0_3 = arith.constant 0 : index
    %c0_4 = arith.constant 0 : index
    %3 = vector.load %arg3[%c0_3, %c0_4] : memref<1x32xf32, #tpu.memory_space<vmem>>, vector<1x32xf32>
    %4 = vector.broadcast %3 : vector<1x32xf32> to vector<2x32xf32>
    %5 = arith.addf %2, %4 : vector<2x32xf32>
    %cst_5 = arith.constant 5.000000e-01 : f32
    %6 = vector.broadcast %cst_5 : f32 to vector<2x32xf32>
    %7 = arith.mulf %6, %5 : vector<2x32xf32>
    %8 = arith.mulf %5, %5 : vector<2x32xf32>
    %9 = arith.mulf %8, %5 : vector<2x32xf32>
    %cst_6 = arith.constant 4.471500e-02 : f32
    %10 = vector.broadcast %cst_6 : f32 to vector<2x32xf32>
    %11 = arith.mulf %10, %9 : vector<2x32xf32>
    %12 = arith.addf %5, %11 : vector<2x32xf32>
    %cst_7 = arith.constant 0.797884583 : f32
    %13 = vector.broadcast %cst_7 : f32 to vector<2x32xf32>
    %14 = arith.mulf %13, %12 : vector<2x32xf32>
    %15 = math.tanh %14 : vector<2x32xf32>
    %cst_8 = arith.constant 1.000000e+00 : f32
    %16 = vector.broadcast %cst_8 : f32 to vector<2x32xf32>
    %17 = arith.addf %16, %15 : vector<2x32xf32>
    %18 = arith.mulf %7, %17 : vector<2x32xf32>
    %19 = arith.addf %18, %0 : vector<2x32xf32>
    %c0_9 = arith.constant 0 : index
    %c0_10 = arith.constant 0 : index
    %20 = vector.load %arg4[%c0_9, %c0_10] : memref<32x32xf32, #tpu.memory_space<vmem>>, vector<32x32xf32>
    %cst_11 = arith.constant dense<0.000000e+00> : vector<2x32xf32>
    %21 = tpu.matmul %19, %20, %cst_11 {dimension_numbers = #tpu.dot_dimension_numbers<[1], [0], [0], [1], [0, 0, 1, 1], [], []>} : vector<2x32xf32>, vector<32x32xf32>, vector<2x32xf32> -> vector<2x32xf32>
    %c0_12 = arith.constant 0 : index
    %c0_13 = arith.constant 0 : index
    %22 = vector.load %arg5[%c0_12, %c0_13] : memref<1x32xf32, #tpu.memory_space<vmem>>, vector<1x32xf32>
    %23 = vector.broadcast %22 : vector<1x32xf32> to vector<2x32xf32>
    %24 = arith.addf %21, %23 : vector<2x32xf32>
    %cst_14 = arith.constant 5.000000e-01 : f32
    %25 = vector.broadcast %cst_14 : f32 to vector<2x32xf32>
    %26 = arith.mulf %25, %24 : vector<2x32xf32>
    %27 = arith.mulf %24, %24 : vector<2x32xf32>
    %28 = arith.mulf %27, %24 : vector<2x32xf32>
    %cst_15 = arith.constant 4.471500e-02 : f32
    %29 = vector.broadcast %cst_15 : f32 to vector<2x32xf32>
    %30 = arith.mulf %29, %28 : vector<2x32xf32>
    %31 = arith.addf %24, %30 : vector<2x32xf32>
    %cst_16 = arith.constant 0.797884583 : f32
    %32 = vector.broadcast %cst_16 : f32 to vector<2x32xf32>
    %33 = arith.mulf %32, %31 : vector<2x32xf32>
    %34 = math.tanh %33 : vector<2x32xf32>
    %cst_17 = arith.constant 1.000000e+00 : f32
    %35 = vector.broadcast %cst_17 : f32 to vector<2x32xf32>
    %36 = arith.addf %35, %34 : vector<2x32xf32>
    %37 = arith.mulf %26, %36 : vector<2x32xf32>
    %38 = arith.addf %37, %19 : vector<2x32xf32>
    %c0_18 = arith.constant 0 : index
    %c0_19 = arith.constant 0 : index
    %39 = vector.load %arg6[%c0_18, %c0_19] : memref<32x32xf32, #tpu.memory_space<vmem>>, vector<32x32xf32>
    %cst_20 = arith.constant dense<0.000000e+00> : vector<2x32xf32>
    %40 = tpu.matmul %38, %39, %cst_20 {dimension_numbers = #tpu.dot_dimension_numbers<[1], [0], [0], [1], [0, 0, 1, 1], [], []>} : vector<2x32xf32>, vector<32x32xf32>, vector<2x32xf32> -> vector<2x32xf32>
    %c0_21 = arith.constant 0 : index
    %c0_22 = arith.constant 0 : index
    %41 = vector.load %arg7[%c0_21, %c0_22] : memref<1x32xf32, #tpu.memory_space<vmem>>, vector<1x32xf32>
    %42 = vector.broadcast %41 : vector<1x32xf32> to vector<2x32xf32>
    %43 = arith.addf %40, %42 : vector<2x32xf32>
    %cst_23 = arith.constant 5.000000e-01 : f32
    %44 = vector.broadcast %cst_23 : f32 to vector<2x32xf32>
    %45 = arith.mulf %44, %43 : vector<2x32xf32>
    %46 = arith.mulf %43, %43 : vector<2x32xf32>
    %47 = arith.mulf %46, %43 : vector<2x32xf32>
    %cst_24 = arith.constant 4.471500e-02 : f32
    %48 = vector.broadcast %cst_24 : f32 to vector<2x32xf32>
    %49 = arith.mulf %48, %47 : vector<2x32xf32>
    %50 = arith.addf %43, %49 : vector<2x32xf32>
    %cst_25 = arith.constant 0.797884583 : f32
    %51 = vector.broadcast %cst_25 : f32 to vector<2x32xf32>
    %52 = arith.mulf %51, %50 : vector<2x32xf32>
    %53 = math.tanh %52 : vector<2x32xf32>
    %cst_26 = arith.constant 1.000000e+00 : f32
    %54 = vector.broadcast %cst_26 : f32 to vector<2x32xf32>
    %55 = arith.addf %54, %53 : vector<2x32xf32>
    %56 = arith.mulf %45, %55 : vector<2x32xf32>
    %57 = arith.addf %56, %38 : vector<2x32xf32>
    %c0_27 = arith.constant 0 : index
    %c0_28 = arith.constant 0 : index
    %58 = vector.load %arg8[%c0_27, %c0_28] : memref<32x32xf32, #tpu.memory_space<vmem>>, vector<32x32xf32>
    %cst_29 = arith.constant dense<0.000000e+00> : vector<2x32xf32>
    %59 = tpu.matmul %57, %58, %cst_29 {dimension_numbers = #tpu.dot_dimension_numbers<[1], [0], [0], [1], [0, 0, 1, 1], [], []>} : vector<2x32xf32>, vector<32x32xf32>, vector<2x32xf32> -> vector<2x32xf32>
    %c0_30 = arith.constant 0 : index
    %c0_31 = arith.constant 0 : index
    %60 = vector.load %arg9[%c0_30, %c0_31] : memref<1x32xf32, #tpu.memory_space<vmem>>, vector<1x32xf32>
    %61 = vector.broadcast %60 : vector<1x32xf32> to vector<2x32xf32>
    %62 = arith.addf %59, %61 : vector<2x32xf32>
    %cst_32 = arith.constant 5.000000e-01 : f32
    %63 = vector.broadcast %cst_32 : f32 to vector<2x32xf32>
    %64 = arith.mulf %63, %62 : vector<2x32xf32>
    %65 = arith.mulf %62, %62 : vector<2x32xf32>
    %66 = arith.mulf %65, %62 : vector<2x32xf32>
    %cst_33 = arith.constant 4.471500e-02 : f32
    %67 = vector.broadcast %cst_33 : f32 to vector<2x32xf32>
    %68 = arith.mulf %67, %66 : vector<2x32xf32>
    %69 = arith.addf %62, %68 : vector<2x32xf32>
    %cst_34 = arith.constant 0.797884583 : f32
    %70 = vector.broadcast %cst_34 : f32 to vector<2x32xf32>
    %71 = arith.mulf %70, %69 : vector<2x32xf32>
    %72 = math.tanh %71 : vector<2x32xf32>
    %cst_35 = arith.constant 1.000000e+00 : f32
    %73 = vector.broadcast %cst_35 : f32 to vector<2x32xf32>
    %74 = arith.addf %73, %72 : vector<2x32xf32>
    %75 = arith.mulf %64, %74 : vector<2x32xf32>
    %76 = arith.addf %75, %57 : vector<2x32xf32>
    %c0_36 = arith.constant 0 : index
    %c0_37 = arith.constant 0 : index
    %77 = vector.load %arg10[%c0_36, %c0_37] : memref<32x16xf32, #tpu.memory_space<vmem>>, vector<32x16xf32>
    %cst_38 = arith.constant dense<0.000000e+00> : vector<2x16xf32>
    %78 = tpu.matmul %76, %77, %cst_38 {dimension_numbers = #tpu.dot_dimension_numbers<[1], [0], [0], [1], [0, 0, 1, 1], [], []>} : vector<2x32xf32>, vector<32x16xf32>, vector<2x16xf32> -> vector<2x16xf32>
    %c0_39 = arith.constant 0 : index
    %c0_40 = arith.constant 0 : index
    %79 = vector.load %arg11[%c0_39, %c0_40] : memref<1x16xf32, #tpu.memory_space<vmem>>, vector<1x16xf32>
    %80 = vector.broadcast %79 : vector<1x16xf32> to vector<2x16xf32>
    %81 = arith.addf %78, %80 : vector<2x16xf32>
    %cst_41 = arith.constant 5.000000e-01 : f32
    %82 = vector.broadcast %cst_41 : f32 to vector<2x16xf32>
    %83 = arith.mulf %82, %81 : vector<2x16xf32>
    %84 = arith.mulf %81, %81 : vector<2x16xf32>
    %85 = arith.mulf %84, %81 : vector<2x16xf32>
    %cst_42 = arith.constant 4.471500e-02 : f32
    %86 = vector.broadcast %cst_42 : f32 to vector<2x16xf32>
    %87 = arith.mulf %86, %85 : vector<2x16xf32>
    %88 = arith.addf %81, %87 : vector<2x16xf32>
    %cst_43 = arith.constant 0.797884583 : f32
    %89 = vector.broadcast %cst_43 : f32 to vector<2x16xf32>
    %90 = arith.mulf %89, %88 : vector<2x16xf32>
    %91 = math.tanh %90 : vector<2x16xf32>
    %cst_44 = arith.constant 1.000000e+00 : f32
    %92 = vector.broadcast %cst_44 : f32 to vector<2x16xf32>
    %93 = arith.addf %92, %91 : vector<2x16xf32>
    %94 = arith.mulf %83, %93 : vector<2x16xf32>
    %c0_45 = arith.constant 0 : index
    %c0_46 = arith.constant 0 : index
    %95 = vector.load %arg12[%c0_45, %c0_46] : memref<2x16xf32, #tpu.memory_space<vmem>>, vector<2x16xf32>
    tpu.vector_store %arg12[%c0_45, %c0_46], %94 {strides = array<i32>} : memref<2x16xf32, #tpu.memory_space<vmem>>, vector<2x16xf32>,
    return
  }
  func.func @transform_0(%arg0: i32) -> (i32, i32) {
    %c0_i32 = arith.constant 0 : i32
    %c0_i32_0 = arith.constant 0 : i32
    return %arg0, %c0_i32 : i32, i32
  }
  func.func @transform_1(%arg0: i32) -> (i32, i32) {
    %c0_i32 = arith.constant 0 : i32
    %c0_i32_0 = arith.constant 0 : i32
    %c0_i32_1 = arith.constant 0 : i32
    return %c0_i32, %c0_i32_0 : i32, i32
  }
  func.func @transform_2(%arg0: i32) -> (i32, i32) {
    %c0_i32 = arith.constant 0 : i32
    %c0_i32_0 = arith.constant 0 : i32
    %c0_i32_1 = arith.constant 0 : i32
    return %c0_i32, %c0_i32_0 : i32, i32
  }
  func.func @transform_3(%arg0: i32) -> (i32, i32) {
    %c0_i32 = arith.constant 0 : i32
    %c0_i32_0 = arith.constant 0 : i32
    %c0_i32_1 = arith.constant 0 : i32
    return %c0_i32, %c0_i32_0 : i32, i32
  }
  func.func @transform_4(%arg0: i32) -> (i32, i32) {
    %c0_i32 = arith.constant 0 : i32
    %c0_i32_0 = arith.constant 0 : i32
    %c0_i32_1 = arith.constant 0 : i32
    return %c0_i32, %c0_i32_0 : i32, i32
  }
  func.func @transform_5(%arg0: i32) -> (i32, i32) {
    %c0_i32 = arith.constant 0 : i32
    %c0_i32_0 = arith.constant 0 : i32
    %c0_i32_1 = arith.constant 0 : i32
    return %c0_i32, %c0_i32_0 : i32, i32
  }
  func.func @transform_6(%arg0: i32) -> (i32, i32) {
    %c0_i32 = arith.constant 0 : i32
    %c0_i32_0 = arith.constant 0 : i32
    %c0_i32_1 = arith.constant 0 : i32
    return %c0_i32, %c0_i32_0 : i32, i32
  }
  func.func @transform_7(%arg0: i32) -> (i32, i32) {
    %c0_i32 = arith.constant 0 : i32
    %c0_i32_0 = arith.constant 0 : i32
    %c0_i32_1 = arith.constant 0 : i32
    return %c0_i32, %c0_i32_0 : i32, i32
  }
  func.func @transform_8(%arg0: i32) -> (i32, i32) {
    %c0_i32 = arith.constant 0 : i32
    %c0_i32_0 = arith.constant 0 : i32
    %c0_i32_1 = arith.constant 0 : i32
    return %c0_i32, %c0_i32_0 : i32, i32
  }
  func.func @transform_9(%arg0: i32) -> (i32, i32) {
    %c0_i32 = arith.constant 0 : i32
    %c0_i32_0 = arith.constant 0 : i32
    %c0_i32_1 = arith.constant 0 : i32
    return %c0_i32, %c0_i32_0 : i32, i32
  }
  func.func @transform_10(%arg0: i32) -> (i32, i32) {
    %c0_i32 = arith.constant 0 : i32
    %c0_i32_0 = arith.constant 0 : i32
    %c0_i32_1 = arith.constant 0 : i32
    return %c0_i32, %c0_i32_0 : i32, i32
  }
  func.func @transform_11(%arg0: i32) -> (i32, i32) {
    %c0_i32 = arith.constant 0 : i32
    %c0_i32_0 = arith.constant 0 : i32
    return %arg0, %c0_i32 : i32, i32
  }
}

</mosaic_0001>

<bundles_post_ra>
// kernel: tpu_custom_call.1
= control target key start
LH: loop header
LB: loop body
LE: loop exit
PB: predicated region body
PF: predicated region fallthrough
CT: control target
= control target key end

     0   :  { %16 = vsyncpa [#allocation3], 0  ;;  %s1139_s0 = inlined_call_operand.vmem [shape: f32[2,32], index: 0, kind: input, shape index: {}]   ;;  %s1140_s1 = inlined_call_operand.vmem [shape: f32[32,32], index: 1, kind: input, shape index: {}]   ;;  %s1141_s2 = inlined_call_operand.hbm [shape: f32[1,32], index: 2, kind: input, shape index: {}]   ;;  %s1142_s3 = inlined_call_operand.hbm [shape: f32[32,32], index: 3, kind: input, shape index: {}]   ;;  %s1143_s4 = inlined_call_operand.hbm [shape: f32[1,32], index: 4, kind: input, shape index: {}]   ;;  %s1144_s5 = inlined_call_operand.vmem [shape: f32[32,32], index: 5, kind: input, shape index: {}]   ;;  %s1145_s6 = inlined_call_operand.hbm [shape: f32[1,32], index: 6, kind: input, shape index: {}]   ;;  %s1146_s7 = inlined_call_operand.hbm [shape: f32[32,32], index: 7, kind: input, shape index: {}]   ;;  %s1147_s8 = inlined_call_operand.hbm [shape: f32[1,32], index: 8, kind: input, shape index: {}]   ;;  %s1148_s9 = inlined_call_operand.vmem [shape: f32[32,16], index: 9, kind: input, shape index: {}]   ;;  %s1149_s10 = inlined_call_operand.vmem [shape: f32[1,16], index: 10, kind: input, shape index: {}]   ;;  %s1150_s11 = inlined_call_operand.hbm [shape: f32[2,16], index: 11, kind: output, shape index: {}]  }
   0x1   :  { %17 = vsyncpa [#allocation6], 0 }
   0x2   :  { %18 = vsyncpa [#allocation9], 0 }
   0x3   :  { %19 = vsyncpa [#allocation12], 0 }
   0x4   :  { %20 = vsyncpa [#allocation4], 0  ;;  %s910_s17 = smov [#allocation5]   ;;  %s746_s21 = scalar_lea.hbm %s1142_s3, 512 }
   0x5   :  { %s40_s18 = sshll.u32 %s910_s17, 4  ;;  %p747_p0 = scmp.ne.s32.totalorder %s1142_s3, %s746_s21  ;;  %s41_s18 = int_to_ptr.vmem [resolvable:$true] %s40_s18 }
   0x6   :  { %p750_p1 = scmp.lt.u32.totalorder %s746_s21, %s1142_s3 }
   0x8   :  { %p752_p2 = pnand %p750_p1, %p747_p0 }
   0xa   :  { %755 = shalt.err (!%p752_p2)
}
   0xb   :  { %s756_s26 = scalar_lea.vmem %s41_s18, 512  ;;  %p761_p4 = scmp.lt.s32.totalorder %s41_s18, %s41_s18 }
   0xc   :  { %p757_p3 = scmp.ne.s32.totalorder %s41_s18, %s756_s26  ;;  %p762_p5 = scmp.lt.s32.totalorder %s756_s26, %s756_s26 }
   0xe   :  { %p763_p6 = por %p762_p5, %p761_p4 }
  0x10   :  { %p764_p7 = pnand %p763_p6, %p757_p3 }
  0x12   :  { %767 = shalt.err (!%p764_p7)
}
  0x13   :  { %s911_s27 = smov 128   ;;  %s912_s28 = smov 8  }
  0x14   :  { %46 = dma.hbm_to_vmem [thread:$0]  %s1142_s3, 512, %s41_s18, [#allocation6], %s911_s27, %s911_s27, %s912_s28  }
  0x15   :  { %s913_s12 = smov [#allocation8]   ;;  %s914_s14 = smov [#allocation2]  }
  0x16   :  { %s65_s13 = sshll.u32 %s913_s12, 4  ;;  %s31_s15 = sshll.u32 %s914_s14, 4  ;;  %s66_s13 = int_to_ptr.vmem [resolvable:$true] %s65_s13  ;;  %s32_s15 = int_to_ptr.vmem [resolvable:$true] %s31_s15 }
  0x17   :  { %s768_s19 = scalar_lea.hbm %s1145_s6, 16 }
  0x18   :  { %p769_p8 = scmp.ne.s32.totalorder %s1145_s6, %s768_s19  ;;  %p772_p9 = scmp.lt.u32.totalorder %s768_s19, %s1145_s6 }
  0x1a   :  { %p774_p10 = pnand %p772_p9, %p769_p8 }
  0x1c   :  { %777 = shalt.err (!%p774_p10)
}
  0x1d   :  { %s778_s3 = scalar_lea.vmem %s66_s13, 16  ;;  %s782_s18 = scalar_lea.vmem %s66_s13, 32 }
  0x1e   :  { %p779_p11 = scmp.ne.s32.totalorder %s66_s13, %s778_s3  ;;  %p783_p12 = scmp.lt.s32.totalorder %s66_s13, %s66_s13 }
  0x1f   :  { %p784_p13 = scmp.lt.s32.totalorder %s782_s18, %s778_s3 }
  0x21   :  { %p785_p0 = por %p784_p13, %p783_p12 }
  0x23   :  { %p786_p1 = pnand %p785_p0, %p779_p11 }
  0x25   :  { %789 = shalt.err (!%p786_p1)
}
  0x26   :  { %68 = dma.hbm_to_vmem [thread:$0]  %s1145_s6, 16, %s66_s13, [#allocation9]  }
  0x27   :  { %s790_s30 = scalar_lea.hbm %s1141_s2, 16 }
  0x28   :  { %p791_p2 = scmp.ne.s32.totalorder %s1141_s2, %s790_s30  ;;  %p794_p3 = scmp.lt.u32.totalorder %s790_s30, %s1141_s2 }
  0x2a   :  { %p796_p4 = pnand %p794_p3, %p791_p2 }
  0x2c   :  { %799 = shalt.err (!%p796_p4)
}
  0x2d   :  { %s800_s19 = scalar_lea.vmem %s32_s15, 16  ;;  %s804_s20 = scalar_lea.vmem %s32_s15, 32 }
  0x2e   :  { %p801_p5 = scmp.ne.s32.totalorder %s32_s15, %s800_s19  ;;  %p805_p6 = scmp.lt.s32.totalorder %s32_s15, %s32_s15 }
  0x2f   :  { %p806_p7 = scmp.lt.s32.totalorder %s804_s20, %s800_s19 }
  0x31   :  { %p807_p8 = por %p806_p7, %p805_p6 }
  0x33   :  { %p808_p9 = pnand %p807_p8, %p801_p5 }
  0x35   :  { %811 = shalt.err (!%p808_p9)
}
  0x36   :  { %34 = dma.hbm_to_vmem [thread:$0]  %s1141_s2, 16, %s32_s15, [#allocation3]  }
  0x37   :  { %s915_s21 = smov [#allocation7]   ;;  %s916_s23 = smov [#allocation10]  }
  0x38   :  { %s53_s22 = sshll.u32 %s915_s21, 4  ;;  %s74_s3 = sshll.u32 %s916_s23, 4  ;;  %s54_s22 = int_to_ptr.vmem [resolvable:$true] %s53_s22  ;;  %s75_s3 = int_to_ptr.vmem [resolvable:$true] %s74_s3 }
  0x39   :  { %s812_s25 = scalar_lea.hbm %s1143_s4, 16 }
  0x3a   :  { %p813_p10 = scmp.ne.s32.totalorder %s1143_s4, %s812_s25  ;;  %p816_p11 = scmp.lt.u32.totalorder %s812_s25, %s1143_s4 }
  0x3c   :  { %p818_p12 = pnand %p816_p11, %p813_p10 }
  0x3e   :  { %821 = shalt.err (!%p818_p12)
}
  0x3f   :  { %s822_s2 = scalar_lea.vmem %s54_s22, 16  ;;  %s826_s15 = scalar_lea.vmem %s54_s22, 32 }
  0x40   :  { %p823_p13 = scmp.ne.s32.totalorder %s54_s22, %s822_s2  ;;  %p827_p0 = scmp.lt.s32.totalorder %s54_s22, %s54_s22 }
  0x41   :  { %p828_p1 = scmp.lt.s32.totalorder %s826_s15, %s822_s2 }
  0x43   :  { %p829_p2 = por %p828_p1, %p827_p0 }
  0x45   :  { %p830_p3 = pnand %p829_p2, %p823_p13 }
  0x47   :  { %833 = shalt.err (!%p830_p3)
}
  0x48   :  { %56 = dma.hbm_to_vmem [thread:$0]  %s1143_s4, 16, %s54_s22, [#allocation6]  }
  0x49   :  { %s834_s20 = scalar_lea.hbm %s1146_s7, 512 }
  0x4a   :  { %p835_p4 = scmp.ne.s32.totalorder %s1146_s7, %s834_s20  ;;  %p838_p5 = scmp.lt.u32.totalorder %s834_s20, %s1146_s7 }
  0x4c   :  { %p840_p6 = pnand %p838_p5, %p835_p4 }
  0x4e   :  { %843 = shalt.err (!%p840_p6)
}
  0x4f   :  { %s844_s18 = scalar_lea.vmem %s75_s3, 512  ;;  %p849_p8 = scmp.lt.s32.totalorder %s75_s3, %s75_s3 }
  0x50   :  { %p845_p7 = scmp.ne.s32.totalorder %s75_s3, %s844_s18  ;;  %p850_p9 = scmp.lt.s32.totalorder %s844_s18, %s844_s18 }
  0x52   :  { %p851_p10 = por %p850_p9, %p849_p8 }
  0x54   :  { %p852_p11 = pnand %p851_p10, %p845_p7 }
  0x56   :  { %855 = shalt.err (!%p852_p11)
}
  0x57   :  { %80 = dma.hbm_to_vmem [thread:$0]  %s1146_s7, 512, %s75_s3, [#allocation9], %s911_s27, %s911_s27, %s912_s28  }
  0x58   :  { %s917_s24 = smov [#allocation11]   ;;  %s856_s30 = scalar_lea.hbm %s1147_s8, 16 }
  0x59   :  { %s87_s25 = sshll.u32 %s917_s24, 4  ;;  %p857_p12 = scmp.ne.s32.totalorder %s1147_s8, %s856_s30  ;;  %s88_s25 = int_to_ptr.vmem [resolvable:$true] %s87_s25 }
  0x5a   :  { %p860_p13 = scmp.lt.u32.totalorder %s856_s30, %s1147_s8 }
  0x5c   :  { %p862_p0 = pnand %p860_p13, %p857_p12 }
  0x5e   :  { %865 = shalt.err (!%p862_p0)
}
  0x5f   :  { %s866_s16 = scalar_lea.vmem %s88_s25, 16  ;;  %s870_s7 = scalar_lea.vmem %s88_s25, 32 }
  0x60   :  { %p867_p1 = scmp.ne.s32.totalorder %s88_s25, %s866_s16  ;;  %p871_p2 = scmp.lt.s32.totalorder %s88_s25, %s88_s25 }
  0x61   :  { %p872_p3 = scmp.lt.s32.totalorder %s870_s7, %s866_s16 }
  0x63   :  { %p873_p4 = por %p872_p3, %p871_p2 }
  0x65   :  { %p874_p5 = pnand %p873_p4, %p867_p1 }
  0x67   :  { %877 = shalt.err (!%p874_p5)
}
  0x68   :  { %90 = dma.hbm_to_vmem [thread:$0]  %s1147_s8, 16, %s88_s25, [#allocation12]  }
  0x69   :  { %900 = dma.done.wait [#allocation3], 16  }
  0x6a   :  { %901 = vsyncadd [#allocation3], 4294967280 }
  0x6b   :  { %902 = dma.done.wait [#allocation6], 528  }
  0x6c   :  { %903 = vsyncadd [#allocation6], 4294966768 }
  0x6d   :  { %904 = dma.done.wait [#allocation9], 528  }
  0x6e   :  { %905 = vsyncadd [#allocation9], 4294966768 }
  0x6f   :  { %906 = dma.done.wait [#allocation12], 16  }
  0x70   :  { %907 = vsyncadd [#allocation12], 4294967280  ;;  %v918_v0 = vmov 0.0|0.0   ;;  %vm919_vm0 = vmmov 0   ;;  %v920_v1 = vmov 0.0   ;;  %v114_v2 = vld [vmem:[%s1140_s1] sm:$0xff] }
  0x71   :  { %694 = vmatprep.subr.bf16.mxu0 %v918_v0  ;;  %647 = vmatprep.mubr.msk.f32.mxu0 %vm919_vm0, %v920_v1  ;;  %v115_v3 = vld [vmem:[%s1140_s1 + $0x8] sm:$0xff]  ;;  %v116_v4 = vld [vmem:[%s1140_s1 + $0x10] sm:$0xff]  ;;  %v117_v6 = vld [vmem:[%s1140_s1 + $0x18] sm:$0xff]  ;;  %vm125_vm1 = vcmask 261120   ;;  %s921_s28 = smov [#allocation13]   ;;  %vm584_vm2 = vcmask 123904  }
  0x72   :  { %700 = vmatprep.subr.bf16.mxu1 %v918_v0  ;;  %658 = vmatprep.mubr.msk.f32.mxu1 %vm919_vm0, %v920_v1  ;;  %v695_v5 = vpack.c.bf16 %v115_v3, %v114_v2  ;;  %v698_v7 = vpack.c.bf16 %v117_v6, %v116_v4  ;;  %v113_v8 = vld [vmem:[%s1139_s0] sm:$0x3]  ;;  %v209_v9 = vld [vmem:[#allocation5] sm:$0xff]  ;;  %v210_v10 = vld [vmem:[#allocation5 + $0x8] sm:$0xff]  ;;  %s592_s8 = sshll.u32 %s921_s28, 4  ;;  %s593_s8 = int_to_ptr.vmem [resolvable:$true] %s592_s8 }
  0x73   :  { %v211_v11 = vld [vmem:[#allocation5 + $0x10] sm:$0xff]  ;;  %v701_v12 = vpack.c.bf16 %v210_v10, %v209_v9  ;;  %v212_v13 = vld [vmem:[#allocation5 + $0x18] sm:$0xff]  ;;  %v304_v30 = vld [vmem:[%s1144_s5 + $0x8] sm:$0xff]  ;;  %s878_s3 = scalar_lea.vmem %s593_s8, 32  ;;  %p883_p7 = scmp.lt.s32.totalorder %s593_s8, %s593_s8 }
  0x74   :  { %696 = vmatpush3.bf16.msra.mxu0 %v695_v5  ;;  %v704_v14 = vpack.c.bf16 %v212_v13, %v211_v11  ;;  %v604_v15 = vld [vmem:[#allocation2] ss:$0 sm:$0xff]  ;;  %v305_v32 = vld [vmem:[%s1144_s5 + $0x10] sm:$0xff]  ;;  %v306_v33 = vld [vmem:[%s1144_s5 + $0x18] sm:$0xff]  ;;  %p879_p6 = scmp.ne.s32.totalorder %s593_s8, %s878_s3  ;;  %p884_p8 = scmp.lt.s32.totalorder %s878_s3, %s878_s3 }
  0x75   :  { %697 = vmatprep.subr.bf16.mxu0 %v918_v0  ;;  %702 = vmatpush3.bf16.msra.mxu1 %v701_v12  ;;  %v303_v29 = vld [vmem:[%s1144_s5] sm:$0xff]  ;;  %v710_v34 = vpack.c.bf16 %v306_v33, %v305_v32  ;;  %v398_v50 = vld [vmem:[#allocation10 + $0x8] sm:$0xff]  ;;  %v399_v52 = vld [vmem:[#allocation10 + $0x10] sm:$0xff] }
  0x76   :  { %703 = vmatprep.subr.bf16.mxu1 %v918_v0  ;;  %v707_v31 = vpack.c.bf16 %v304_v30, %v303_v29  ;;  %v606_v35 = vld [vmem:[#allocation7] ss:$0 sm:$0xff]  ;;  %v397_v49 = vld [vmem:[#allocation10] sm:$0xff]  ;;  %v608_v55 = vld [vmem:[#allocation8] ss:$0 sm:$0xff]  ;;  %p885_p9 = por %p884_p8, %p883_p7 }
  0x77   :  { %v713_v51 = vpack.c.bf16 %v398_v50, %v397_v49  ;;  %v400_v53 = vld [vmem:[#allocation10 + $0x18] sm:$0xff]  ;;  %v493_v9 = vld [vmem:[%s1148_s9 + $0x10] sm:$0xff]  ;;  %v610_v12 = vld [vmem:[#allocation11] ss:$0 sm:$0xff] }
  0x78   :  { %699 = vmatpush3.bf16.msra.mxu0 %v698_v7  ;;  %v716_v54 = vpack.c.bf16 %v400_v53, %v399_v52  ;;  %v491_v6 = vld [vmem:[%s1148_s9] sm:$0xff]  ;;  %v492_v7 = vld [vmem:[%s1148_s9 + $0x8] sm:$0xff]  ;;  %v494_v10 = vld [vmem:[%s1148_s9 + $0x18] sm:$0xff]  ;;  %p886_p10 = pnand %p885_p9, %p879_p6 }
  0x79   :  { %706 = vmatprep.subr.bf16.mxu0 %v918_v0  ;;  %705 = vmatpush3.bf16.msra.mxu1 %v704_v14  ;;  %v722_v11 = vpack.c.bf16 %v494_v10, %v493_v9 }
  0x7a   :  { %712 = vmatprep.subr.bf16.mxu1 %v918_v0 }
  0x7b   :  { %648 = vmatmul.mubr.msk.f32.vlgmr.msra.gmra.mrb[0].mxu0 %vm125_vm1, %v113_v8 }
  0x7c   :  { %669 = vmatprep.mubr.msk.f32.mxu0 %vm919_vm0, %v920_v1  ;;  %708 = vmatpush3.bf16.msra.mxu0 %v707_v31 }
  0x7d   :  { %709 = vmatprep.subr.bf16.mxu0 %v918_v0 }
  0x80   :  { %711 = vmatpush3.bf16.msra.mxu0 %v710_v34 }
  0x81   :  { %718 = vmatprep.subr.bf16.mxu0 %v918_v0 }
 0x14e   :  { %v195_v16 = vpop.f32.mrb[0].mxu0 }
 0x14f   :  { %v196_v17 = vadd.f32 %v604_v15, %v195_v16  ;;  %v649_v18 = vpop.f32.mrb[1].mxu0 }
 0x151   :  { %v200_v19 = vmul.f32 %v196_v17, %v196_v17  ;;  %v199_v25 = vmul.f32 0.5, %v196_v17 }
 0x153   :  { %v201_v20 = vmul.f32 %v200_v19, %v196_v17 }
 0x155   :  { %v202_v21 = vmul.f32 0.044715, %v201_v20 }
 0x157   :  { %v203_v22 = vadd.f32 %v202_v21, %v196_v17 }
 0x159   :  { %v204_v23 = vmul.f32 0.7978846, %v203_v22 }
 0x15b   :  { %736 = vtanh.f32 %v204_v23 }
 0x165   :  { %v737_v24 = vpop.eup %736 }
 0x166   :  { %v206_v26 = vadd.f32 1.0, %v737_v24 }
 0x168   :  { %v207_v27 = vmul.f32 %v206_v26, %v199_v25  ;;  %v612_v25 = vld [vmem:[%s1149_s10] ss:$0 sm:$0xff] }
 0x16a   :  { %v208_v28 = vadd.f32 %v207_v27, %v113_v8  ;;  %v719_v8 = vpack.c.bf16 %v492_v7, %v491_v6 }
 0x16c   :  { %659 = vmatmul.mubr.msk.f32.vlgmr.msra.gmra.mrb[0].mxu1 %vm125_vm1, %v208_v28 }
 0x16d   :  { %680 = vmatprep.mubr.msk.f32.mxu1 %vm919_vm0, %v920_v1  ;;  %714 = vmatpush3.bf16.msra.mxu1 %v713_v51 }
 0x16e   :  { %715 = vmatprep.subr.bf16.mxu1 %v918_v0 }
 0x171   :  { %717 = vmatpush3.bf16.msra.mxu1 %v716_v54 }
 0x23f   :  { %v289_v36 = vpop.f32.mrb[0].mxu1 }
 0x240   :  { %v290_v37 = vadd.f32 %v606_v35, %v289_v36  ;;  %v660_v38 = vpop.f32.mrb[1].mxu1 }
 0x242   :  { %v294_v39 = vmul.f32 %v290_v37, %v290_v37  ;;  %v293_v45 = vmul.f32 0.5, %v290_v37 }
 0x244   :  { %v295_v40 = vmul.f32 %v294_v39, %v290_v37 }
 0x246   :  { %v296_v41 = vmul.f32 0.044715, %v295_v40 }
 0x248   :  { %v297_v42 = vadd.f32 %v296_v41, %v290_v37 }
 0x24a   :  { %v298_v43 = vmul.f32 0.7978846, %v297_v42 }
 0x24c   :  { %738 = vtanh.f32 %v298_v43 }
 0x256   :  { %v739_v44 = vpop.eup %738 }
 0x257   :  { %v300_v46 = vadd.f32 1.0, %v739_v44 }
 0x259   :  { %v301_v47 = vmul.f32 %v300_v46, %v293_v45 }
 0x25b   :  { %v302_v48 = vadd.f32 %v301_v47, %v208_v28 }
 0x25d   :  { %670 = vmatmul.mubr.msk.f32.vlgmr.msra.gmra.mrb[2].mxu0 %vm125_vm1, %v302_v48 }
 0x25e   :  { %691 = vmatprep.mubr.msk.f32.mxu0 %vm919_vm0, %v920_v1  ;;  %720 = vmatpush3.bf16.msra.mxu0 %v719_v8 }
 0x25f   :  { %721 = vmatprep.subr.bf16.mxu0 %v918_v0 }
 0x262   :  { %723 = vmatpush3.bf16.msra.mxu0 %v722_v11 }
 0x330   :  { %v383_v56 = vpop.f32.mrb[2].mxu0 }
 0x331   :  { %v384_v57 = vadd.f32 %v608_v55, %v383_v56  ;;  %v671_v58 = vpop.f32.mrb[3].mxu0 }
 0x333   :  { %v388_v59 = vmul.f32 %v384_v57, %v384_v57  ;;  %v387_v2 = vmul.f32 0.5, %v384_v57 }
 0x335   :  { %v389_v60 = vmul.f32 %v388_v59, %v384_v57 }
 0x337   :  { %v390_v61 = vmul.f32 0.044715, %v389_v60 }
 0x339   :  { %v391_v62 = vadd.f32 %v390_v61, %v384_v57 }
 0x33b   :  { %v392_v63 = vmul.f32 0.7978846, %v391_v62 }
 0x33d   :  { %740 = vtanh.f32 %v392_v63 }
 0x347   :  { %v741_v1 = vpop.eup %740 }
 0x348   :  { %v394_v3 = vadd.f32 1.0, %v741_v1 }
 0x34a   :  { %v395_v4 = vmul.f32 %v394_v3, %v387_v2 }
 0x34c   :  { %v396_v5 = vadd.f32 %v395_v4, %v302_v48 }
 0x34e   :  { %681 = vmatmul.mubr.msk.f32.vlgmr.msra.gmra.mrb[2].mxu1 %vm125_vm1, %v396_v5 }
 0x421   :  { %v477_v13 = vpop.f32.mrb[2].mxu1 }
 0x422   :  { %v478_v14 = vadd.f32 %v610_v12, %v477_v13  ;;  %v682_v15 = vpop.f32.mrb[3].mxu1 }
 0x424   :  { %v482_v16 = vmul.f32 %v478_v14, %v478_v14  ;;  %v481_v21 = vmul.f32 0.5, %v478_v14 }
 0x426   :  { %v483_v17 = vmul.f32 %v482_v16, %v478_v14 }
 0x428   :  { %v484_v18 = vmul.f32 0.044715, %v483_v17 }
 0x42a   :  { %v485_v19 = vadd.f32 %v484_v18, %v478_v14 }
 0x42c   :  { %v486_v20 = vmul.f32 0.7978846, %v485_v19 }
 0x42e   :  { %742 = vtanh.f32 %v486_v20 }
 0x438   :  { %v743_v0 = vpop.eup %742 }
 0x439   :  { %v488_v22 = vadd.f32 1.0, %v743_v0 }
 0x43b   :  { %v489_v23 = vmul.f32 %v488_v22, %v481_v21 }
 0x43d   :  { %v490_v24 = vadd.f32 %v489_v23, %v396_v5 }
 0x43f   :  { %692 = vmatmul.mubr.msk.f32.vlgmr.msra.gmra.mrb[4].mxu0 %vm125_vm1, %v490_v24 }
 0x512   :  { %v571_v26 = vpop.f32.mrb[4].mxu0 }
 0x513   :  { %v572_v27 = vadd.f32 %v612_v25, %v571_v26  ;;  %v693_v28 = vpop.f32.mrb[5].mxu0 }
 0x515   :  { %v576_v29 = vmul.f32 %v572_v27, %v572_v27  ;;  %v575_v35 = vmul.f32 0.5, %v572_v27 }
 0x517   :  { %v577_v30 = vmul.f32 %v576_v29, %v572_v27 }
 0x519   :  { %v578_v31 = vmul.f32 0.044715, %v577_v30 }
 0x51b   :  { %v579_v32 = vadd.f32 %v578_v31, %v572_v27 }
 0x51d   :  { %v580_v33 = vmul.f32 0.7978846, %v579_v32 }
 0x51f   :  { %744 = vtanh.f32 %v580_v33 }
 0x529   :  { %v745_v34 = vpop.eup %744 }
 0x52a   :  { %v582_v36 = vadd.f32 1.0, %v745_v34 }
 0x52c   :  { %v583_v37 = vmul.f32 %v582_v36, %v575_v35 }
 0x52e   :  { %585 = vst.msk [vmem:[#allocation13] sm:$0x3] %vm584_vm2, %v583_v37 }
 0x52f   :  { %889 = shalt.err (!%p886_p10)
}
 0x530   :  { %s890_s19 = scalar_lea.hbm %s1150_s11, 32 }
 0x531   :  { %p891_p11 = scmp.ne.s32.totalorder %s1150_s11, %s890_s19  ;;  %p894_p12 = scmp.lt.u32.totalorder %s890_s19, %s1150_s11 }
 0x533   :  { %p896_p13 = pnand %p894_p12, %p891_p11 }
 0x535   :  { %899 = shalt.err (!%p896_p13)
}
 0x536   :  { %595 = dma.vmem_to_hbm [thread:$0]  %s593_s8, 32, %s1150_s11, [#allocation4]  }
 0x537   :  { %908 = dma.done.wait [#allocation4], 32  }
 0x538   :  { %909 = vsyncadd [#allocation4], 4294967264 }
 0x539   :  { %599 = vsyncpa [#allocation3], 1 }
 0x53a   :  { %600 = vsyncpa [#allocation6], 1 }
 0x53b   :  { %601 = vsyncpa [#allocation9], 1 }
 0x53c   :  { %602 = vsyncpa [#allocation12], 1 }
 0x53d   :  { %603 = vsyncpa [#allocation4], 1 }

</bundles_post_ra>
